<compile_context>
chip_gen: v7x
topology: tpu7x:2x2x1
jax: 0.10.0
libtpu: 0.0.40
codegen_flags: <defaults>
</compile_context>

<pallas_src>
import jax
import jax.numpy as jnp
from jax.experimental import pallas as pl
from jax.experimental.pallas import tpu as pltpu

LN_EPS = 1e-12


def bert_self_output_kernel(hs_ref, res_ref, w_ref, b_ref, g_ref, beta_ref,
                            out_ref):
    # hs_ref : (tm, H) bf16 activation tile        res_ref/out_ref : (tm, H)
    # w_ref  : (H, H) bf16, (in, out) layout       b/g/beta : (1, H) f32
    # Dense projection: bf16 MXU operands, f32 accumulation.
    h = jnp.dot(hs_ref[...], w_ref[...],
                preferred_element_type=jnp.float32) + b_ref[...]
    # Dropout is identity in eval mode.
    x = h + res_ref[...].astype(jnp.float32)           # residual add in f32
    # TF-style LayerNorm (epsilon inside the sqrt), statistics in f32.
    u = jnp.mean(x, axis=-1, keepdims=True)
    d = x - u
    s = jnp.mean(d * d, axis=-1, keepdims=True)
    xn = d * jax.lax.rsqrt(s + LN_EPS)                  # rsqrt -> EUP slot
    out_ref[...] = (g_ref[...] * xn + beta_ref[...]).astype(out_ref.dtype)


def _select_row_tile(M, H, res_itemsize, out_itemsize,
                     target_tm=1024, vmem_budget=40 << 20):
    """Fixed-target row tile that fits a conservative VMEM budget."""
    # Resident parameter bytes (weight + 3 per-channel vectors), counted at 2
    # buffers worst case; the constant index_map means they're DMA'd only once.
    param_bytes = 2 * (H * H * 2) + 2 * 3 * (H * 4)
    # Per-row VMEM bytes: bf16 hs (x2 buffers) + residual (x2) + output (x2)
    # + ~4 f32 LayerNorm intermediates (h, x, d, xn) that spill past the vregs.
    per_row = H * (2 * 2 + 2 * res_itemsize + 2 * out_itemsize + 4 * 4)
    tm_fit = max(8, ((vmem_budget - param_bytes) // per_row) // 8 * 8)
    tm = int(min(target_tm, tm_fit))
    # Guarantee >= 2 grid steps when M allows it so both v7x TensorCores work.
    if M >= 16:
        tm = min(tm, max(8, ((M // 2) // 8) * 8))
    tm = max(tm, 8)
    vmem_limit = int(min(max(1.5 * (param_bytes + tm * per_row), 16 << 20),
                         56 << 20))
    return tm, vmem_limit


def prepare_params(dense_weight_out_in, dense_bias, ln_weight, ln_bias):
    """One-time parameter prep; hoist this out of the per-step call path.

    `dense_weight_out_in` uses the PyTorch nn.Linear layout (out, in); it is
    transposed to (in, out) and cast to bf16 exactly once here.
    """
    return {
        "w": jnp.asarray(dense_weight_out_in).T.astype(jnp.bfloat16),
        "b": jnp.asarray(dense_bias, jnp.float32).reshape(1, -1),
        "ln_w": jnp.asarray(ln_weight, jnp.float32).reshape(1, -1),
        "ln_b": jnp.asarray(ln_bias, jnp.float32).reshape(1, -1),
    }


def bert_self_output(hidden_states, input_tensor, params, out_dtype=None):
    """BertSelfOutput.forward.  hidden_states/input_tensor: (B, S, H)."""
    B, S, H = hidden_states.shape
    M = B * S
    out_dtype = out_dtype or hidden_states.dtype

    w = params["w"]
    if w.dtype != jnp.bfloat16:          # no-op when prepare_params was used
        w = w.astype(jnp.bfloat16)
    b = params["b"].astype(jnp.float32).reshape(1, H)
    g = params["ln_w"].astype(jnp.float32).reshape(1, H)
    beta = params["ln_b"].astype(jnp.float32).reshape(1, H)

    # bf16 matmul activation halves its HBM traffic (the MXU operand is bf16
    # either way); the residual stays in the input dtype so the f32 residual
    # add / LN statistics are unchanged.
    hs2 = hidden_states.reshape(M, H).astype(jnp.bfloat16)
    res2 = input_tensor.reshape(M, H)

    tm, vmem_limit = _select_row_tile(M, H, res2.dtype.itemsize,
                                      jnp.dtype(out_dtype).itemsize)

    # Padded cdiv grid: robust for any B*S; padded rows compute on zeros and
    # are sliced off afterwards.
    n_blocks = pl.cdiv(M, tm)
    M_pad = n_blocks * tm
    if M_pad != M:
        hs2 = jnp.pad(hs2, ((0, M_pad - M), (0, 0)))
        res2 = jnp.pad(res2, ((0, M_pad - M), (0, 0)))

    def act_spec():
        return pl.BlockSpec((tm, H), lambda i: (i, 0))

    def param_spec(shape):
        # Grid-invariant parameter: constant index_map, fetched once and reused.
        return pl.BlockSpec(shape, lambda i: (0, 0))

    grid_spec = pltpu.PrefetchScalarGridSpec(
        num_scalar_prefetch=0,
        grid=(n_blocks,),
        in_specs=[act_spec(), act_spec(),
                  param_spec(w.shape), param_spec(b.shape),
                  param_spec(g.shape), param_spec(beta.shape)],
        out_specs=pl.BlockSpec((tm, H), lambda i: (i, 0)),
    )

    out2 = pl.pallas_call(
        bert_self_output_kernel,
        out_shape=jax.ShapeDtypeStruct((M_pad, H), out_dtype),
        grid_spec=grid_spec,
        compiler_params=pltpu.CompilerParams(
            dimension_semantics=("parallel",),
            vmem_limit_bytes=vmem_limit),
    )(hs2, res2, w, b, g, beta)

    return out2[:M].reshape(B, S, H)


if __name__ == "__main__":
    # Small config consistent with the module.
    B, S, H = 2, 8, 32

    key = jax.random.PRNGKey(0)
    k_hs, k_res, k_w, k_b = jax.random.split(key, 4)

    hidden_states = jax.random.normal(k_hs, (B, S, H), jnp.float32)
    input_tensor = jax.random.normal(k_res, (B, S, H), jnp.float32)

    # PyTorch nn.Linear layout: weight is (out_features, in_features).
    w_out_in = jax.random.normal(k_w, (H, H), jnp.float32) * 0.02
    bias = jax.random.normal(k_b, (H,), jnp.float32) * 0.02
    ln_w = jnp.ones((H,), jnp.float32)
    ln_b = jnp.zeros((H,), jnp.float32)

    # One-time prep (transpose + bf16 cast hoisted out of the call path).
    params = prepare_params(w_out_in, bias, ln_w, ln_b)

    out = bert_self_output(hidden_states, input_tensor, params)
    jax.block_until_ready(out)

    # Pure-JAX f32 reference (PyTorch semantics, PyTorch weight layout).
    def ref(hs, res):
        h = hs @ w_out_in.T + bias
        x = h + res
        u = x.mean(-1, keepdims=True)
        s = ((x - u) ** 2).mean(-1, keepdims=True)
        xn = (x - u) / jnp.sqrt(s + LN_EPS)
        return ln_w * xn + ln_b

    expected = ref(hidden_states, input_tensor)

    assert out.shape == (B, S, H)
    assert bool(jnp.all(jnp.isfinite(out)))
    max_err = float(jnp.max(jnp.abs(out - expected)))
    assert max_err < 5e-2, max_err   # bf16 MXU operands, f32 accumulation/LN
    print("KERNEL_OK")
</pallas_src>

<mosaic_0001>
module attributes {stable_mosaic.version = 11 : i64} {
  func.func @bert_self_output_kernel(%arg0: i32, %arg1: memref<8x32xbf16, #tpu.memory_space<vmem>>, %arg2: memref<8x32xf32, #tpu.memory_space<vmem>>, %arg3: memref<32x32xbf16, #tpu.memory_space<vmem>>, %arg4: memref<1x32xf32, #tpu.memory_space<vmem>>, %arg5: memref<1x32xf32, #tpu.memory_space<vmem>>, %arg6: memref<1x32xf32, #tpu.memory_space<vmem>>, %arg7: memref<8x32xf32, #tpu.memory_space<vmem>>) attributes {dimension_semantics = [#tpu.dimension_semantics<parallel>], iteration_bounds = array<i64: 2>, scalar_prefetch = 0 : i64, scratch_operands = 0 : i64, tpu.core_type = #tpu.core_type<tc>, window_params = [{transform_indices = @transform_0, window_bounds = array<i64: 8, 32>}, {transform_indices = @transform_1, window_bounds = array<i64: 8, 32>}, {pipeline_mode = #tpu.pipeline_mode<synchronous>, transform_indices = @transform_2, window_bounds = array<i64: 32, 32>}, {pipeline_mode = #tpu.pipeline_mode<synchronous>, transform_indices = @transform_3, window_bounds = array<i64: 1, 32>}, {pipeline_mode = #tpu.pipeline_mode<synchronous>, transform_indices = @transform_4, window_bounds = array<i64: 1, 32>}, {pipeline_mode = #tpu.pipeline_mode<synchronous>, transform_indices = @transform_5, window_bounds = array<i64: 1, 32>}, {transform_indices = @transform_6, window_bounds = array<i64: 8, 32>}]} {
    %c0 = arith.constant 0 : index
    %c0_0 = arith.constant 0 : index
    %0 = vector.load %arg1[%c0, %c0_0] : memref<8x32xbf16, #tpu.memory_space<vmem>>, vector<8x32xbf16>
    %c0_1 = arith.constant 0 : index
    %c0_2 = arith.constant 0 : index
    %1 = vector.load %arg3[%c0_1, %c0_2] : memref<32x32xbf16, #tpu.memory_space<vmem>>, vector<32x32xbf16>
    %cst = arith.constant dense<0.000000e+00> : vector<8x32xf32>
    %2 = tpu.matmul %0, %1, %cst {dimension_numbers = #tpu.dot_dimension_numbers<[1], [0], [0], [1], [0, 0, 1, 1], [], []>} : vector<8x32xbf16>, vector<32x32xbf16>, vector<8x32xf32> -> vector<8x32xf32>
    %c0_3 = arith.constant 0 : index
    %c0_4 = arith.constant 0 : index
    %3 = vector.load %arg4[%c0_3, %c0_4] : memref<1x32xf32, #tpu.memory_space<vmem>>, vector<1x32xf32>
    %4 = vector.broadcast %3 : vector<1x32xf32> to vector<8x32xf32>
    %5 = arith.addf %2, %4 : vector<8x32xf32>
    %c0_5 = arith.constant 0 : index
    %c0_6 = arith.constant 0 : index
    %6 = vector.load %arg2[%c0_5, %c0_6] : memref<8x32xf32, #tpu.memory_space<vmem>>, vector<8x32xf32>
    %7 = arith.addf %5, %6 : vector<8x32xf32>
    %cst_7 = arith.constant dense<0.000000e+00> : vector<8xf32>
    %8 = vector.multi_reduction <add>, %7, %cst_7 [1] : vector<8x32xf32> to vector<8xf32>
    %9 = vector.shape_cast %8 : vector<8xf32> to vector<8x1xf32>
    %cst_8 = arith.constant 3.200000e+01 : f32
    %10 = vector.broadcast %cst_8 : f32 to vector<8x1xf32>
    %11 = arith.divf %9, %10 : vector<8x1xf32>
    %12 = vector.broadcast %11 : vector<8x1xf32> to vector<8x32xf32>
    %13 = arith.subf %7, %12 : vector<8x32xf32>
    %14 = arith.mulf %13, %13 : vector<8x32xf32>
    %cst_9 = arith.constant dense<0.000000e+00> : vector<8xf32>
    %15 = vector.multi_reduction <add>, %14, %cst_9 [1] : vector<8x32xf32> to vector<8xf32>
    %16 = vector.shape_cast %15 : vector<8xf32> to vector<8x1xf32>
    %cst_10 = arith.constant 3.200000e+01 : f32
    %17 = vector.broadcast %cst_10 : f32 to vector<8x1xf32>
    %18 = arith.divf %16, %17 : vector<8x1xf32>
    %cst_11 = arith.constant 9.99999996E-13 : f32
    %19 = vector.broadcast %cst_11 : f32 to vector<8x1xf32>
    %20 = arith.addf %18, %19 : vector<8x1xf32>
    %21 = math.rsqrt %20 : vector<8x1xf32>
    %22 = vector.broadcast %21 : vector<8x1xf32> to vector<8x32xf32>
    %23 = arith.mulf %13, %22 : vector<8x32xf32>
    %c0_12 = arith.constant 0 : index
    %c0_13 = arith.constant 0 : index
    %24 = vector.load %arg5[%c0_12, %c0_13] : memref<1x32xf32, #tpu.memory_space<vmem>>, vector<1x32xf32>
    %25 = vector.broadcast %24 : vector<1x32xf32> to vector<8x32xf32>
    %26 = arith.mulf %25, %23 : vector<8x32xf32>
    %c0_14 = arith.constant 0 : index
    %c0_15 = arith.constant 0 : index
    %27 = vector.load %arg6[%c0_14, %c0_15] : memref<1x32xf32, #tpu.memory_space<vmem>>, vector<1x32xf32>
    %28 = vector.broadcast %27 : vector<1x32xf32> to vector<8x32xf32>
    %29 = arith.addf %26, %28 : vector<8x32xf32>
    %c0_16 = arith.constant 0 : index
    %c0_17 = arith.constant 0 : index
    %30 = vector.load %arg7[%c0_16, %c0_17] : memref<8x32xf32, #tpu.memory_space<vmem>>, vector<8x32xf32>
    tpu.vector_store %arg7[%c0_16, %c0_17], %29 {strides = array<i32>} : memref<8x32xf32, #tpu.memory_space<vmem>>, vector<8x32xf32>,
    return
  }
  func.func @transform_0(%arg0: i32) -> (i32, i32) {
    %c0_i32 = arith.constant 0 : i32
    %c0_i32_0 = arith.constant 0 : i32
    return %arg0, %c0_i32 : i32, i32
  }
  func.func @transform_1(%arg0: i32) -> (i32, i32) {
    %c0_i32 = arith.constant 0 : i32
    %c0_i32_0 = arith.constant 0 : i32
    return %arg0, %c0_i32 : i32, i32
  }
  func.func @transform_2(%arg0: i32) -> (i32, i32) {
    %c0_i32 = arith.constant 0 : i32
    %c0_i32_0 = arith.constant 0 : i32
    %c0_i32_1 = arith.constant 0 : i32
    return %c0_i32, %c0_i32_0 : i32, i32
  }
  func.func @transform_3(%arg0: i32) -> (i32, i32) {
    %c0_i32 = arith.constant 0 : i32
    %c0_i32_0 = arith.constant 0 : i32
    %c0_i32_1 = arith.constant 0 : i32
    return %c0_i32, %c0_i32_0 : i32, i32
  }
  func.func @transform_4(%arg0: i32) -> (i32, i32) {
    %c0_i32 = arith.constant 0 : i32
    %c0_i32_0 = arith.constant 0 : i32
    %c0_i32_1 = arith.constant 0 : i32
    return %c0_i32, %c0_i32_0 : i32, i32
  }
  func.func @transform_5(%arg0: i32) -> (i32, i32) {
    %c0_i32 = arith.constant 0 : i32
    %c0_i32_0 = arith.constant 0 : i32
    %c0_i32_1 = arith.constant 0 : i32
    return %c0_i32, %c0_i32_0 : i32, i32
  }
  func.func @transform_6(%arg0: i32) -> (i32, i32) {
    %c0_i32 = arith.constant 0 : i32
    %c0_i32_0 = arith.constant 0 : i32
    return %arg0, %c0_i32 : i32, i32
  }
}

</mosaic_0001>

<bundles_post_ra>
// kernel: tpu_custom_call.1
= control target key start
LH: loop header
LB: loop body
LE: loop exit
PB: predicated region body
PF: predicated region fallthrough
CT: control target
= control target key end

     0   :  { %s1099_s0 = inlined_call_operand.hbm [shape: bf16[16,32], index: 0, kind: input, shape index: {}]   ;;  %s1100_s1 = inlined_call_operand.hbm [shape: f32[16,32], index: 1, kind: input, shape index: {}]   ;;  %s1101_s2 = inlined_call_operand.hbm [shape: bf16[32,32], index: 2, kind: input, shape index: {}]   ;;  %s1102_s3 = inlined_call_operand.vmem [shape: f32[1,32], index: 3, kind: input, shape index: {}]   ;;  %s1103_s4 = inlined_call_operand.vmem [shape: f32[1,32], index: 4, kind: input, shape index: {}]   ;;  %s1104_s5 = inlined_call_operand.vmem [shape: f32[1,32], index: 5, kind: input, shape index: {}]   ;;  %s1105_s6 = inlined_call_operand.hbm [shape: f32[16,32], index: 6, kind: output, shape index: {}]  }
   0x1   :  { %1110 = sst [smem:[#allocation13_spill]] %s1099_s0 }
   0x2   :  { %1111 = sst [smem:[#allocation14_spill]] %s1101_s2 }
   0x3   :  { %11 = vsyncpa [#allocation3], 0 }
   0x4   :  { %13 = vsyncpa [#allocation3 + $0x1], 0 }
   0x5   :  { %14 = vsyncpa [#allocation6], 0 }
   0x6   :  { %16 = vsyncpa [#allocation6 + $0x1], 0 }
   0x7   :  { %17 = vsyncpa [#allocation4], 0 }
   0x8   :  { %19 = vsyncpa [#allocation4 + $0x1], 0  ;;  %s847_s21 = smov 0   ;;  %s849_s22 = smov 0  }
   0x9   :  { %s851_s23 = smov 0   ;;  %s853_s24 = smov 0  }
   0xa LB: > { %s868_s25 = sadd.s32 4294967295, %s802_s24   ;;  %s536_s26 = sadd.s32 4294967294, %s802_s24   ;;  %s802_s24 = sphi %s853_s24, %s1132_s24   ;;  %s798_s23 = sphi %s851_s23, %s1131_s23   ;;  %s794_s22 = sphi %s849_s22, %s1130_s22   ;;  %s790_s21 = sphi %s847_s21, %s1129_s21  }
   0xb   : > { %p45_p0 = scmp.ne.s32.totalorder %s794_s22, %s790_s21  ;;  %p1106_p1 = scmp.eq.s32.totalorder %s868_s25, 0 }
   0xc   : > { %p185_p3 = scmp.eq.s32.totalorder %s536_s26, 1  ;;  %p537_p5 = scmp.ge.s32.totalorder %s802_s24, 1 }
   0xd   : > { %p877_p4 = por %p1106_p1, %p45_p0  ;;  %p192_p7 = scmp.lt.s32.totalorder %s802_s24, 3 }
   0xe   : > { %p882_p6 = por %p185_p3, %p45_p0  ;;  %s804_s30 = smov [#allocation7]  }
   0xf   : > { %s1112_s27 = scalar_select %p877_p4, 1, 0 }
  0x10   : > { %s1113_s28 = scalar_select %p882_p6, 1, 0 }
  0x11   : > { %p887_p8 = pnand %p537_p5, %p192_p7  ;;  %s204_s7 = sshll.u32 %s804_s30, 4  ;;  %s891_s7 = int_to_ptr.vmem [resolvable:$true] %s204_s7 }
  0x12   : > { %s903_s9 = sadd.s32 1, %s802_s24   ;;  %s32_s10 = sadd.s32 1, %s798_s23 }
  0x13   : > { %s1114_s29 = scalar_select %p887_p8, 1, 0 }
  0x14   : > { %p580_p9 = pneg %p887_p8  ;;  %s29_s11 = ssub.s32 %s802_s24, %s903_s9 }
  0x15   : > { %s1116_s2 = sld [smem:[#allocation14_spill]] }
  0x16   : > { %p898_p11 = pnand %p580_p9, %p1106_p1 }
  0x18   : > { %p642_p13 = pneg %p898_p11 }
  0x1b   : > { %s640_s14 = scalar_lea.hbm %s1116_s2, 256 }
  0x1c   : > { %p641_p12 = scmp.ne.s32.totalorder %s1116_s2, %s640_s14  ;;  %p647_p5 = scmp.lt.u32.totalorder %s640_s14, %s1116_s2 }
  0x1e   : > { %p643_p0 = pnand %p642_p13, %p641_p12 }
  0x20   : > { %p644_p3 = pneg %p643_p0 }
  0x22   : > { %p649_p7 = pnand %p647_p5, %p644_p3 }
  0x24   : > { %652 = shalt.err (!%p649_p7)
}
  0x25   : > { %s653_s19 = scalar_lea.vmem %s891_s7, 256  ;;  %p661_p2 = scmp.lt.s32.totalorder %s891_s7, %s891_s7 }
  0x26   : > { %p654_p9 = scmp.ne.s32.totalorder %s891_s7, %s653_s19  ;;  %p662_p6 = scmp.lt.s32.totalorder %s653_s19, %s653_s19 }
  0x28   : > { %p656_p10 = pnand %p654_p9, %p642_p13  ;;  %p663_p4 = por %p662_p6, %p661_p2 }
  0x2a   : > { %p657_p1 = pneg %p656_p10 }
  0x2c   : > { %p664_p8 = pnand %p663_p4, %p657_p1 }
  0x2e   : > { %667 = shalt.err (!%p664_p8)
}
  0x2f   : > { %s805_s20 = smov 64   ;;  %s806_s26 = smov 4  }
  0x30   : > { %583 = dma.hbm_to_vmem [thread:$0]  (!%p898_p11), %s1116_s2, 256, %s891_s7, [#allocation6], %s805_s20, %s805_s20, %s806_s26  }
  0x31   : > { %p30_p1 = scmp.eq.s32.totalorder %s29_s11, 0  ;;  %p39_p2 = scmp.ne.s32.totalorder %s798_s23, %s794_s22 }
  0x32   : > { %p40_p4 = scmp.eq.s32.totalorder %s802_s24, 0  ;;  %p596_p6 = scmp.lt.s32.totalorder %s802_s24, 2 }
  0x33   : > { %s934_s13 = scalar_select %p30_p1, %s798_s23, %s32_s10  }
  0x34   : > { %p41_p8 = por %p40_p4, %p39_p2  ;;  %p1117_p10 = scmp.eq.s32.totalorder %s868_s25, 1 }
  0x35   : > { %s943_s15 = sand.u32 1, %s798_s23   ;;  %s541_s8 = sshll.u32 %s802_s24, 6 }
  0x36   : > { %p938_p12 = por %p1117_p10, %p39_p2  ;;  %s540_s16 = sshll.u32 %s943_s15, 2 }
  0x37   : > { %s1119_s0 = sld [smem:[#allocation13_spill]]  ;;  %s231_s10 = scalar_lea.vmem [#allocation2], %s540_s16 }
  0x38   : > { %s1118_s14 = scalar_select %p938_p12, 1, 0 }
  0x39   : > { %s238_s18 = sshll.u32 %s231_s10, 4  ;;  %p952_p11 = pnand %p596_p6, %p41_p8  ;;  %s956_s18 = int_to_ptr.vmem [resolvable:$true] %s238_s18 }
  0x3a   : > { %s228_s26 = scalar_lea.sflag [#allocation3], %s943_s15 }
  0x3b   : > { %p670_p0 = pneg %p952_p11 }
  0x3d   : > { %s950_s11 = scalar_lea.hbm %s1119_s0, %s541_s8  ;;  %s673_s16 = scalar_lea.hbm %s1119_s0, 128 }
  0x3e   : > { %s668_s30 = scalar_lea.hbm %s950_s11, 64  ;;  %p674_p7 = scmp.lt.u32.totalorder %s950_s11, %s1119_s0 }
  0x3f   : > { %p669_p13 = scmp.ne.s32.totalorder %s950_s11, %s668_s30  ;;  %p675_p9 = scmp.lt.u32.totalorder %s673_s16, %s668_s30 }
  0x40   : > { %p677_p2 = scmp.lt.u32.totalorder %s668_s30, %s950_s11 }
  0x41   : > { %p671_p3 = pnand %p670_p0, %p669_p13  ;;  %p676_p1 = por %p675_p9, %p674_p7 }
  0x43   : > { %p672_p5 = pneg %p671_p3  ;;  %p678_p4 = por %p677_p2, %p676_p1 }
  0x45   : > { %p679_p6 = pnand %p678_p4, %p672_p5 }
  0x47   : > { %682 = shalt.err (!%p679_p6)
}
  0x48   : > { %s683_s10 = scalar_lea.vmem %s956_s18, 64  ;;  %s807_s12 = smov [#allocation2]  }
  0x49   : > { %p684_p8 = scmp.ne.s32.totalorder %s956_s18, %s683_s10  ;;  %s688_s8 = sshll.u32 %s807_s12, 4  ;;  %s689_s8 = int_to_ptr.vmem [resolvable:$false] %s688_s8 }
  0x4a   : > { %s690_s7 = scalar_lea.vmem %s689_s8, 128  ;;  %p691_p3 = scmp.lt.s32.totalorder %s956_s18, %s689_s8 }
  0x4b   : > { %p686_p10 = pnand %p684_p8, %p670_p0  ;;  %p692_p7 = scmp.lt.s32.totalorder %s690_s7, %s683_s10 }
  0x4d   : > { %p687_p13 = pneg %p686_p10  ;;  %p693_p9 = por %p692_p7, %p691_p3 }
  0x4f   : > { %p694_p1 = pnand %p693_p9, %p687_p13 }
  0x51   : > { %697 = shalt.err (!%p694_p1)
}
  0x52   : > { %587 = dma.hbm_to_vmem [thread:$0]  (!%p952_p11), %s950_s11, 64, %s956_s18, %s228_s26  }
  0x53   : > { %s542_s30 = sshll.u32 %s943_s15, 3  ;;  %s543_s16 = sshll.u32 %s802_s24, 7 }
  0x54   : > { %s990_s20 = scalar_lea.hbm %s1100_s1, %s543_s16  ;;  %s249_s10 = scalar_lea.vmem [#allocation5], %s542_s30 }
  0x55   : > { %s256_s8 = sshll.u32 %s249_s10, 4  ;;  %s1121_s7 = sand.u32 1, %s802_s24   ;;  %s257_s8 = int_to_ptr.vmem [resolvable:$true] %s256_s8 }
  0x56   : > { %s246_s0 = scalar_lea.sflag [#allocation6], %s1121_s7  ;;  %s698_s2 = scalar_lea.hbm %s990_s20, 128 }
  0x57   : > { %p699_p5 = scmp.ne.s32.totalorder %s990_s20, %s698_s2  ;;  %s703_s18 = scalar_lea.hbm %s1100_s1, 256 }
  0x58   : > { %p704_p6 = scmp.lt.u32.totalorder %s990_s20, %s1100_s1  ;;  %p705_p8 = scmp.lt.u32.totalorder %s703_s18, %s698_s2 }
  0x59   : > { %p701_p2 = pnand %p699_p5, %p670_p0  ;;  %p707_p13 = scmp.lt.u32.totalorder %s698_s2, %s990_s20 }
  0x5a   : > { %p706_p10 = por %p705_p8, %p704_p6 }
  0x5b   : > { %p702_p4 = pneg %p701_p2 }
  0x5c   : > { %p708_p3 = por %p707_p13, %p706_p10 }
  0x5e   : > { %p709_p7 = pnand %p708_p3, %p702_p4 }
  0x60   : > { %712 = shalt.err (!%p709_p7)
}
  0x61   : > { %s713_s30 = scalar_lea.vmem %s257_s8, 128  ;;  %s808_s17 = smov [#allocation5]  }
  0x62   : > { %p714_p9 = scmp.ne.s32.totalorder %s257_s8, %s713_s30  ;;  %s718_s12 = sshll.u32 %s808_s17, 4  ;;  %s719_s12 = int_to_ptr.vmem [resolvable:$false] %s718_s12 }
  0x63   : > { %s720_s10 = scalar_lea.vmem %s719_s12, 256  ;;  %p721_p2 = scmp.lt.s32.totalorder %s257_s8, %s719_s12 }
  0x64   : > { %p716_p1 = pnand %p714_p9, %p670_p0  ;;  %p722_p12 = scmp.lt.s32.totalorder %s720_s10, %s713_s30 }
  0x66   : > { %p717_p5 = pneg %p716_p1  ;;  %p723_p6 = por %p722_p12, %p721_p2 }
  0x68   : > { %p724_p8 = pnand %p723_p6, %p717_p5 }
  0x6a   : > { %727 = shalt.err (!%p724_p8)
}
  0x6b   : > { %590 = dma.hbm_to_vmem [thread:$0]  (!%p952_p11), %s990_s20, 128, %s257_s8, %s246_s0  }
  0x6c   : > { %p1122_p4 = scmp.ne.s32.totalorder %s1114_s29, 0 }
  0x6d   : > { %s1016_s2 = sand.u32 (!%p1122_p4), 1, %s794_s22   ;;  %p1123_p0 = scmp.ne.s32.totalorder (!%p1122_p4), %s1112_s27, 0 }
  0x6e   : > { %265 = sbr.rel (%p1122_p4) target bundleno = 676 (0x2a4), region = 44  ;;  %s545_s7 = sshll.u32 (!%p1122_p4), %s1016_s2, 2 }
  0x6f   : > { %s268_s15 = scalar_lea.sflag (!%p1122_p4), [#allocation3], %s1016_s2  ;;  %s271_s11 = scalar_lea.vmem (!%p1122_p4), [#allocation2], %s545_s7 }
  0x75   : > { %773 = dma.done.wait (%p1123_p0), %s268_s15, 64  }
  0x76   : > { %775 = vsyncadd (%p1123_p0), %s268_s15, 4294967232  ;;  %s276_s0 = sand.u32 1, %s868_s25   ;;  %s546_s29 = sshll.u32 %s1016_s2, 3 }
  0x77   : > { %s277_s19 = scalar_lea.sflag [#allocation6], %s276_s0  ;;  %s280_s20 = scalar_lea.vmem [#allocation5], %s546_s29 }
  0x78   : > { %777 = dma.done.wait (%p1123_p0), %s277_s19, 128  }
  0x79   : > { %779 = vsyncadd (%p1123_p0), %s277_s19, 4294967168  ;;  %p1124_p12 = scmp.eq.s32.totalorder %s868_s25, 0 }
  0x7b   : > { %781 = dma.done.wait (%p1124_p12), [#allocation6], 256   ;;  %p1125_p11 = pmov %p1124_p12 }
  0x7c   : > { %v809_v0 = vmov 0.0   ;;  %vm810_vm0 = vmmov 0   ;;  %v636_v1 = vld [vmem:[#allocation7] sm:$0xff]   ;;  %v637_v2 = vld [vmem:[#allocation7 + $0x8] sm:$0xff]   ;;  %vm343_vm1 = vcmask 261120   ;;  %v387_v6 = vld [vmem:[%s280_s20] sm:$0xff] }
  0x7d   : > { %783 = vsyncadd (%p1125_p11), [#allocation6], 4294967040  ;;  %562 = vmatprep.subr.bf16.mxu0 %v809_v0  ;;  %566 = vmatprep.mubr.msk.bf16.mxu0 %vm810_vm0, %v809_v0  ;;  %v319_v3 = vld [vmem:[%s271_s11] sm:$0xf]  ;;  %s556_s17 = sshll.u32 %s868_s25, 7  ;;  %s317_s12 = scalar_lea.vmem [#allocation8], %s546_s29 }
  0x7e   : > { %563 = vmatpush3.bf16.msra.mxu0 %v636_v1  ;;  %v549_v4 = vld [vmem:[%s1102_s3] ss:$0 sm:$0xff]  ;;  %s434_s10 = sshll.u32 %s317_s12, 4  ;;  %s1054_s11 = scalar_lea.hbm %s1105_s6, %s556_s17  ;;  %s1056_s10 = int_to_ptr.vmem [resolvable:$true] %s434_s10 }
  0x7f   : > { %564 = vmatprep.subr.bf16.mxu0 %v809_v0  ;;  %v553_v22 = vld [vmem:[%s1103_s4] ss:$0 sm:$0xff]  ;;  %s421_s0 = scalar_lea.sflag [#allocation4], %s1016_s2  ;;  %s728_s19 = scalar_lea.vmem %s1056_s10, 128 }
  0x80   : > { %v554_v24 = vld [vmem:[%s1104_s5] ss:$0 sm:$0xff]  ;;  %p729_p10 = scmp.ne.s32.totalorder %s1056_s10, %s728_s19  ;;  %p1126_p13 = scmp.ne.s32.totalorder %s1118_s14, 0 }
  0x81   : > { %s811_s25 = smov [#allocation8]  }
  0x82   : > { %565 = vmatpush3.bf16.msra.mxu0 %v637_v2  ;;  %p730_p3 = pnand %p729_p10, %p1126_p13  ;;  %s732_s29 = sshll.u32 %s811_s25, 4  ;;  %s733_s29 = int_to_ptr.vmem [resolvable:$false] %s732_s29 }
  0x83   : > { %s734_s20 = scalar_lea.vmem %s733_s29, 256  ;;  %p735_p9 = scmp.lt.s32.totalorder %s1056_s10, %s733_s29 }
  0x84   : > { %p731_p7 = pneg %p730_p3  ;;  %p736_p1 = scmp.lt.s32.totalorder %s734_s20, %s728_s19 }
  0x85   : > { %567 = vmatmul.mubr.msk.bf16.vlgmr.msra.gmra.mrb[0].mxu0 %vm343_vm1, %v319_v3 }
  0x86   : > { %p737_p5 = por %p736_p1, %p735_p9 }
  0x88   : > { %p738_p2 = pnand %p737_p5, %p731_p7 }
 0x158   : > { %v381_v5 = vpop.f32.mrb[0].mxu0 }
 0x159   : > { %v382_v7 = vadd.f32 %v549_v4, %v381_v5  ;;  %v568_v8 = vpop.f32.mrb[1].mxu0 }
 0x15a   : > { %v384_v9 = vpop.f32.mrb[2].mxu0 }
 0x15b   : > { %v569_v10 = vpop.f32.mrb[3].mxu0  ;;  %v388_v11 = vadd.f32 %v387_v6, %v382_v7 }
 0x15d   : > { %v389_v12 = vsel %vm343_vm1, %v388_v11, 0.0 }
 0x15e   : > { %390 = vadd.xlane.f32.xlu0 %v389_v12 }
 0x1eb   : > { %v391_v13 = vpop.xlane.xlu0 %390 }
 0x1ec   : > { %v393_v14 = vmul.f32 0.03125, %v391_v13 }
 0x1ee   : > { %v394_v15 = vsub.f32 %v388_v11, %v393_v14 }
 0x1f0   : > { %v395_v16 = vmul.f32 %v394_v15, %v394_v15 }
 0x1f2   : > { %v396_v17 = vsel %vm343_vm1, %v395_v16, 0.0 }
 0x1f3   : > { %397 = vadd.xlane.f32.xlu0 %v396_v17 }
 0x280   : > { %v398_v18 = vpop.xlane.xlu0 %397 }
 0x281   : > { %v399_v19 = vmul.f32 0.03125, %v398_v18 }
 0x283   : > { %v400_v20 = vadd.f32 1e-12, %v399_v19 }
 0x285   : > { %638 = vrsqrt.f32 %v400_v20 }
 0x28f   : > { %v639_v21 = vpop.eup %638 }
 0x290   : > { %v402_v23 = vmul.f32 %v639_v21, %v394_v15 }
 0x292   : > { %v410_v25 = vmul.f32 %v553_v22, %v402_v23 }
 0x294   : > { %v418_v26 = vadd.f32 %v554_v24, %v410_v25 }
 0x296   : > { %419 = vst.msk [vmem:[%s317_s12] sm:$0xff] %vm343_vm1, %v418_v26 }
 0x297   : > { %741 = shalt.err (!%p738_p2)
}
 0x298   : > { %s742_s2 = scalar_lea.hbm %s1054_s11, 128  ;;  %s746_s18 = scalar_lea.hbm %s1105_s6, 256 }
 0x299   : > { %p743_p6 = scmp.ne.s32.totalorder %s1054_s11, %s742_s2  ;;  %p747_p0 = scmp.lt.u32.totalorder %s1054_s11, %s1105_s6 }
 0x29a   : > { %p748_p12 = scmp.lt.u32.totalorder %s746_s18, %s742_s2  ;;  %p750_p10 = scmp.lt.u32.totalorder %s742_s2, %s1054_s11 }
 0x29b   : > { %p744_p8 = pnand %p743_p6, %p1126_p13 }
 0x29c   : > { %p749_p11 = por %p748_p12, %p747_p0 }
 0x29d   : > { %p745_p4 = pneg %p744_p8 }
 0x29e   : > { %p751_p3 = por %p750_p10, %p749_p11 }
 0x2a0   : > { %p752_p7 = pnand %p751_p3, %p745_p4 }
 0x2a2   : > { %755 = shalt.err (!%p752_p7)
}
 0x2a3   : > { %578 = dma.vmem_to_hbm [thread:$0]  (%p1126_p13), %s1056_s10, 128, %s1054_s11, %s421_s0  }
 0x2a4 PF: > { %s446_s30 = sand.u32 1, %s790_s21   ;;  %p1127_p9 = scmp.ne.s32.totalorder %s1113_s28, 0 }
 0x2a5   : > { %p1128_p1 = scmp.ge.s32.totalorder %s802_s24, 2  ;;  %s447_s17 = scalar_lea.sflag [#allocation4], %s446_s30 }
 0x2a7   : > { %p592_p5 = pnand %p1128_p1, %p1127_p9 }
 0x2a9   : > { %785 = dma.done.wait (!%p592_p5), %s447_s17, 128  }
 0x2aa   : > { %787 = vsyncadd (!%p592_p5), %s447_s17, 4294967168  ;;  %p22_p2 = scmp.ge.s32.totalorder %s903_s9, 4   ;;  %s1129_s21 = smov %s794_s22 }
 0x2ab   : > { %s1130_s22 = smov %s798_s23  ;;  %s1131_s23 = smov %s934_s13 }
 0x2ac   : > { %s1132_s24 = smov %s903_s9  ;;  %24 = sbr.rel (!%p22_p2) target bundleno = 10 (0xa), region = 106 }
 0x2b3   :  { %452 = vsyncpa [#allocation3], 1 }
 0x2b4   :  { %454 = vsyncpa [#allocation3 + $0x1], 1 }
 0x2b5   :  { %455 = vsyncpa [#allocation6], 1 }
 0x2b6   :  { %457 = vsyncpa [#allocation6 + $0x1], 1 }
 0x2b7   :  { %458 = vsyncpa [#allocation4], 1 }
 0x2b8   :  { %460 = vsyncpa [#allocation4 + $0x1], 1 }

</bundles_post_ra>
